<compile_context>
chip_gen: v5e
topology: v5e:2x2
jax: 0.10.0
libtpu: 0.0.40
codegen_flags: <defaults>
</compile_context>

<pallas_src>
import math

import jax
import jax.numpy as jnp
from jax import lax
from jax.experimental import pallas as pl
from jax.experimental.pallas import tpu as pltpu

_MIB = 1024 * 1024


def _sublane_multiple(dtype) -> int:
    """Row-tile alignment: 8 rows for 4-byte, 16 for 2-byte, 32 for 1-byte dtypes."""
    itemsize = jnp.dtype(dtype).itemsize
    return max(8, 32 // itemsize)


def _round_up(x: int, m: int) -> int:
    return ((x + m - 1) // m) * m


def _round_down(x: int, m: int) -> int:
    return (x // m) * m


def _vmem_limit_bytes() -> int:
    """Generation-aware VMEM limit: ~96 MiB on v5e/v6e (128 MiB physical),
    ~48 MiB on v7x (64 MiB physical); conservative fallback otherwise."""
    phys = 64 * _MIB
    try:
        phys = int(pltpu.get_tpu_info().vmem_capacity_bytes)
    except Exception:
        pass
    return max(32 * _MIB, min((phys * 3) // 4, 96 * _MIB))


def _make_kernel(eps: float, n_feat: int, activation: str,
                 has_weight: bool, packed: bool):
    inv_n = 1.0 / float(n_feat)

    def kernel(*refs):
        it = iter(refs)
        x_ref = next(it)
        g_ref = next(it)
        w_ref = next(it) if has_weight else None
        s_ref = next(it) if packed else None
        o_ref = next(it)

        x = x_ref[...].astype(jnp.float32)           # (TM, L)
        g = g_ref[...].astype(jnp.float32)           # (TM, L)

        if packed:
            # Each 128k-lane row holds P logical rows side by side. Segment
            # sums via a block-diagonal 0/1 matrix on the MXU (free slot);
            # result is already broadcast to every lane of its segment.
            # HIGHEST keeps the sums f32-exact (default would bf16-truncate x).
            s = s_ref[...]                            # (L, L) f32
            sum_x = jnp.dot(x, s, precision=lax.Precision.HIGHEST,
                            preferred_element_type=jnp.float32)
            mean = sum_x * inv_n
            xc = x - mean
            sum_sq = jnp.dot(xc * xc, s, precision=lax.Precision.HIGHEST,
                             preferred_element_type=jnp.float32)
        else:
            # Two-pass stats (XLU reductions); avoids E[x^2]-mean^2 cancellation.
            mean = jnp.sum(x, axis=-1, keepdims=True) * inv_n
            xc = x - mean
            sum_sq = jnp.sum(xc * xc, axis=-1, keepdims=True)

        var = sum_sq * inv_n
        rstd = lax.rsqrt(var + eps)
        xhat = xc * rstd

        y = xhat * w_ref[...].astype(jnp.float32) if has_weight else xhat

        sig_g = lax.logistic(g)                       # EUP slot
        if activation in ("swish", "silu"):
            out = y * (g * sig_g)
        else:                                         # "sigmoid"
            out = y * sig_g

        o_ref[...] = out.astype(o_ref.dtype)

    return kernel


def fused_layer_norm_gated(x, g, weight=None, *, eps: float = 1e-5,
                           activation: str = "swish"):
    """Forward of FusedLayerNormGated (bias=False, residual=None, prenorm=False)."""
    # TODO(synk): residual / prenorm (residual_out) and bias paths of the Triton
    # kernel are not implemented; module defaults do not use them.
    assert x.shape == g.shape
    if activation not in ("swish", "silu", "sigmoid"):
        raise ValueError(f"Unsupported activation: {activation}")

    orig_shape = x.shape
    n = orig_shape[-1]
    has_weight = weight is not None
    if has_weight:
        assert weight.shape == (n,)

    x2 = x.reshape(-1, n)
    g2 = g.reshape(-1, n)
    m = x2.shape[0]
    dtype = x.dtype
    itemsize = jnp.dtype(dtype).itemsize

    # Lane packing for narrow hidden sizes: pack P = lane/N logical rows per
    # lane-dense row (lane = lcm(N, 128)) so loads/stores are unmasked and
    # full vregs are used. Capped at lane <= 512 to keep the segment-sum
    # matmul cost negligible relative to HBM traffic.
    lane_lcm = (n * 128) // math.gcd(n, 128)
    if n < 128 and lane_lcm <= 512:
        pack, lane = lane_lcm // n, lane_lcm
    else:
        pack, lane = 1, n
    # TODO(synk): N >= 128 that is not a multiple of 128 still uses masked
    # (partial-lane) loads/stores; correct but not lane-dense.

    # Narrow-N only: pad by <= pack-1 rows so rows divide evenly into packed
    # rows. No tm-alignment padding anywhere: Pallas handles the ragged last
    # row-block, so the common wide-N path has zero extra HBM copies.
    row_pad = (-m) % pack
    m_aligned = m + row_pad
    if row_pad:
        x2 = jnp.pad(x2, ((0, row_pad), (0, 0)))
        g2 = jnp.pad(g2, ((0, row_pad), (0, 0)))
    m_packed = m_aligned // pack
    if pack > 1:
        xp = x2.reshape(m_packed, lane)
        gp = g2.reshape(m_packed, lane)
    else:
        xp, gp = x2, g2

    # ---- Tile sizing --------------------------------------------------------
    sub = _sublane_multiple(dtype)
    vmem_limit = _vmem_limit_bytes()
    # ~4 MiB input blocks on 128 MiB-VMEM chips (v5e/v6e), ~2 MiB on v7x.
    target_block = 4 * _MIB if vmem_limit >= 80 * _MIB else 2 * _MIB

    # Resident bytes per packed row: x/g/out double-buffered in the input dtype
    # plus ~2 block-sizes of f32 temps / Mosaic internal scratch.
    bytes_per_row = lane * (6 * itemsize + 8)
    fixed = (2 * lane * 4 if has_weight else 0) + \
            (2 * lane * lane * 4 if pack > 1 else 0)

    tm_target = max(sub, _round_down(target_block // (lane * itemsize), sub))
    tm_cap = max(sub, _round_down(
        max(vmem_limit - fixed, bytes_per_row * sub) // bytes_per_row, sub))
    tm = min(tm_target, tm_cap)

    # Keep >= 8 row blocks so v7x's 2 TensorCores both get work on the
    # "parallel" axis, but never shrink blocks below ~512 KiB (per-step
    # pipeline overhead amortization on v5e/v6e).
    if pl.cdiv(m_packed, tm) < 8:
        tm_floor = max(sub, _round_down((512 * 1024) // (lane * itemsize), sub))
        tm_split = _round_up(pl.cdiv(m_packed, 8), sub)
        tm = min(tm, max(tm_floor, tm_split))
    # Short inputs: a full-extent row block is always legal (== array dim).
    tm = max(1, min(tm, m_packed))

    grid = (pl.cdiv(m_packed, tm),)

    # ---- Specs --------------------------------------------------------------
    inputs = [xp, gp]
    in_specs = [
        pl.BlockSpec((tm, lane), lambda i: (i, 0)),
        pl.BlockSpec((tm, lane), lambda i: (i, 0)),
    ]
    if has_weight:
        w_row = (jnp.tile(weight, pack) if pack > 1 else weight).reshape(1, lane)
        inputs.append(w_row)
        in_specs.append(pl.BlockSpec((1, lane), lambda i: (0, 0)))
    if pack > 1:
        seg = jnp.arange(lane, dtype=jnp.int32) // n
        seg_sum = (seg[:, None] == seg[None, :]).astype(jnp.float32)  # (L, L)
        inputs.append(seg_sum)
        in_specs.append(pl.BlockSpec((lane, lane), lambda i: (0, 0)))

    kernel = _make_kernel(eps=float(eps), n_feat=n, activation=activation,
                          has_weight=has_weight, packed=(pack > 1))

    out = pl.pallas_call(
        kernel,
        out_shape=jax.ShapeDtypeStruct((m_packed, lane), dtype),
        grid_spec=pltpu.PrefetchScalarGridSpec(
            num_scalar_prefetch=0,
            grid=grid,
            in_specs=in_specs,
            out_specs=pl.BlockSpec((tm, lane), lambda i: (i, 0)),
        ),
        compiler_params=pltpu.CompilerParams(
            dimension_semantics=("parallel",),   # 2-TC split on v7x
            vmem_limit_bytes=vmem_limit,
        ),
    )(*inputs)

    if pack > 1:
        out = out.reshape(m_aligned, n)
        if row_pad:
            out = out[:m]
    return out.reshape(orig_shape)


def _reference(x, g, weight, eps=1e-5, activation="swish"):
    xf = x.astype(jnp.float32)
    gf = g.astype(jnp.float32)
    mean = jnp.mean(xf, axis=-1, keepdims=True)
    var = jnp.mean((xf - mean) ** 2, axis=-1, keepdims=True)
    xhat = (xf - mean) / jnp.sqrt(var + eps)
    y = xhat * weight.astype(jnp.float32) if weight is not None else xhat
    sig = jax.nn.sigmoid(gf)
    if activation in ("swish", "silu"):
        y = y * gf * sig
    else:
        y = y * sig
    return y.astype(x.dtype)


if __name__ == "__main__":
    key = jax.random.PRNGKey(0)
    k1, k2, k3, k4, k5, k6 = jax.random.split(key, 6)

    # Case 1: module-typical small shape (hidden=32 < 128 -> lane-packed, pack=4).
    batch, seq, hidden = 2, 8, 32
    x = jax.random.normal(k1, (batch, seq, hidden), dtype=jnp.float32)
    g = jax.random.normal(k2, (batch, seq, hidden), dtype=jnp.float32)
    weight = jnp.ones((hidden,), dtype=jnp.float32)   # reset_parameters(): ones
    out = jax.block_until_ready(
        fused_layer_norm_gated(x, g, weight, eps=1e-5, activation="swish"))
    ref = _reference(x, g, weight, eps=1e-5)
    assert out.shape == x.shape and out.dtype == x.dtype
    assert jnp.allclose(out, ref, atol=1e-5, rtol=1e-5), (
        float(jnp.max(jnp.abs(out - ref))))

    # Case 2: wide hidden (multiple of 128) with ragged row count — exercises
    # the no-pad / no-slice ragged-last-block path and the affine weight.
    rows, hidden2 = 18, 256
    x2 = jax.random.normal(k3, (rows, hidden2), dtype=jnp.float32)
    g2 = jax.random.normal(k4, (rows, hidden2), dtype=jnp.float32)
    w2 = jnp.linspace(0.5, 1.5, hidden2, dtype=jnp.float32)
    out2 = jax.block_until_ready(
        fused_layer_norm_gated(x2, g2, w2, eps=1e-5, activation="swish"))
    ref2 = _reference(x2, g2, w2, eps=1e-5)
    assert jnp.allclose(out2, ref2, atol=1e-5, rtol=1e-5), (
        float(jnp.max(jnp.abs(out2 - ref2))))

    # Case 3: narrow non-power-of-two hidden (48 -> lcm packing, lane=384,
    # pack=8) with a row count that is not a multiple of pack (<= pack-1 pad).
    x3 = jax.random.normal(k5, (3, 5, 48), dtype=jnp.float32)
    g3 = jax.random.normal(k6, (3, 5, 48), dtype=jnp.float32)
    w3 = jnp.ones((48,), dtype=jnp.float32)
    out3 = jax.block_until_ready(
        fused_layer_norm_gated(x3, g3, w3, eps=1e-5, activation="swish"))
    ref3 = _reference(x3, g3, w3, eps=1e-5)
    assert out3.shape == x3.shape and out3.dtype == x3.dtype
    assert jnp.allclose(out3, ref3, atol=1e-5, rtol=1e-5), (
        float(jnp.max(jnp.abs(out3 - ref3))))

    print("KERNEL_OK")
</pallas_src>

<mosaic_0001>
module attributes {stable_mosaic.version = 11 : i64} {
  func.func @kernel(%arg0: i32, %arg1: memref<4x128xf32, #tpu.memory_space<vmem>>, %arg2: memref<4x128xf32, #tpu.memory_space<vmem>>, %arg3: memref<1x128xf32, #tpu.memory_space<vmem>>, %arg4: memref<128x128xf32, #tpu.memory_space<vmem>>, %arg5: memref<4x128xf32, #tpu.memory_space<vmem>>) attributes {dimension_semantics = [#tpu.dimension_semantics<parallel>], iteration_bounds = array<i64: 1>, scalar_prefetch = 0 : i64, scratch_operands = 0 : i64, tpu.core_type = #tpu.core_type<tc>, window_params = [{transform_indices = @transform_0, window_bounds = array<i64: 4, 128>}, {transform_indices = @transform_1, window_bounds = array<i64: 4, 128>}, {pipeline_mode = #tpu.pipeline_mode<synchronous>, transform_indices = @transform_2, window_bounds = array<i64: 1, 128>}, {pipeline_mode = #tpu.pipeline_mode<synchronous>, transform_indices = @transform_3, window_bounds = array<i64: 128, 128>}, {transform_indices = @transform_4, window_bounds = array<i64: 4, 128>}]} {
    %c0 = arith.constant 0 : index
    %c0_0 = arith.constant 0 : index
    %0 = vector.load %arg1[%c0, %c0_0] : memref<4x128xf32, #tpu.memory_space<vmem>>, vector<4x128xf32>
    %c0_1 = arith.constant 0 : index
    %c0_2 = arith.constant 0 : index
    %1 = vector.load %arg2[%c0_1, %c0_2] : memref<4x128xf32, #tpu.memory_space<vmem>>, vector<4x128xf32>
    %c0_3 = arith.constant 0 : index
    %c0_4 = arith.constant 0 : index
    %2 = vector.load %arg4[%c0_3, %c0_4] : memref<128x128xf32, #tpu.memory_space<vmem>>, vector<128x128xf32>
    %cst = arith.constant dense<0.000000e+00> : vector<4x128xf32>
    %3 = tpu.matmul %0, %2, %cst {dimension_numbers = #tpu.dot_dimension_numbers<[1], [0], [0], [1], [0, 0, 1, 1], [], []>, precision = #tpu.contract_precision<fp32>} : vector<4x128xf32>, vector<128x128xf32>, vector<4x128xf32> -> vector<4x128xf32>
    %cst_5 = arith.constant 3.125000e-02 : f32
    %4 = vector.broadcast %cst_5 : f32 to vector<4x128xf32>
    %5 = arith.mulf %3, %4 : vector<4x128xf32>
    %6 = arith.subf %0, %5 : vector<4x128xf32>
    %7 = arith.mulf %6, %6 : vector<4x128xf32>
    %cst_6 = arith.constant dense<0.000000e+00> : vector<4x128xf32>
    %8 = tpu.matmul %7, %2, %cst_6 {dimension_numbers = #tpu.dot_dimension_numbers<[1], [0], [0], [1], [0, 0, 1, 1], [], []>, precision = #tpu.contract_precision<fp32>} : vector<4x128xf32>, vector<128x128xf32>, vector<4x128xf32> -> vector<4x128xf32>
    %cst_7 = arith.constant 3.125000e-02 : f32
    %9 = vector.broadcast %cst_7 : f32 to vector<4x128xf32>
    %10 = arith.mulf %8, %9 : vector<4x128xf32>
    %cst_8 = arith.constant 9.99999974E-6 : f32
    %11 = vector.broadcast %cst_8 : f32 to vector<4x128xf32>
    %12 = arith.addf %10, %11 : vector<4x128xf32>
    %13 = math.rsqrt %12 : vector<4x128xf32>
    %14 = arith.mulf %6, %13 : vector<4x128xf32>
    %c0_9 = arith.constant 0 : index
    %c0_10 = arith.constant 0 : index
    %15 = vector.load %arg3[%c0_9, %c0_10] : memref<1x128xf32, #tpu.memory_space<vmem>>, vector<1x128xf32>
    %16 = vector.broadcast %15 : vector<1x128xf32> to vector<4x128xf32>
    %17 = arith.mulf %14, %16 : vector<4x128xf32>
    %18 = arith.negf %1 : vector<4x128xf32>
    %19 = math.exp %18 : vector<4x128xf32>
    %cst_11 = arith.constant 1.000000e+00 : f32
    %20 = vector.broadcast %cst_11 : f32 to vector<4x128xf32>
    %21 = arith.addf %20, %19 : vector<4x128xf32>
    %22 = arith.divf %20, %21 : vector<4x128xf32>
    %23 = arith.mulf %1, %22 : vector<4x128xf32>
    %24 = arith.mulf %17, %23 : vector<4x128xf32>
    %c0_12 = arith.constant 0 : index
    %c0_13 = arith.constant 0 : index
    %25 = vector.load %arg5[%c0_12, %c0_13] : memref<4x128xf32, #tpu.memory_space<vmem>>, vector<4x128xf32>
    tpu.vector_store %arg5[%c0_12, %c0_13], %24 {strides = array<i32>} : memref<4x128xf32, #tpu.memory_space<vmem>>, vector<4x128xf32>,
    return
  }
  func.func @transform_0(%arg0: i32) -> (i32, i32) {
    %c0_i32 = arith.constant 0 : i32
    %c0_i32_0 = arith.constant 0 : i32
    return %arg0, %c0_i32 : i32, i32
  }
  func.func @transform_1(%arg0: i32) -> (i32, i32) {
    %c0_i32 = arith.constant 0 : i32
    %c0_i32_0 = arith.constant 0 : i32
    return %arg0, %c0_i32 : i32, i32
  }
  func.func @transform_2(%arg0: i32) -> (i32, i32) {
    %c0_i32 = arith.constant 0 : i32
    %c0_i32_0 = arith.constant 0 : i32
    %c0_i32_1 = arith.constant 0 : i32
    return %c0_i32, %c0_i32_0 : i32, i32
  }
  func.func @transform_3(%arg0: i32) -> (i32, i32) {
    %c0_i32 = arith.constant 0 : i32
    %c0_i32_0 = arith.constant 0 : i32
    %c0_i32_1 = arith.constant 0 : i32
    return %c0_i32, %c0_i32_0 : i32, i32
  }
  func.func @transform_4(%arg0: i32) -> (i32, i32) {
    %c0_i32 = arith.constant 0 : i32
    %c0_i32_0 = arith.constant 0 : i32
    return %arg0, %c0_i32 : i32, i32
  }
}

</mosaic_0001>

<bundles_post_ra>
// kernel: tpu_custom_call.1
= control target key start
LH: loop header
LB: loop body
LE: loop exit
PB: predicated region body
PF: predicated region fallthrough
CT: control target
= control target key end

     0   :  { %9 = vsyncpa [#allocation3], 0  ;;  %s1379_s0 = inlined_call_operand.hbm [shape: f32[4,128], index: 0, kind: input, shape index: {}]   ;;  %s1380_s1 = inlined_call_operand.hbm [shape: f32[4,128], index: 1, kind: input, shape index: {}]   ;;  %s1381_s2 = inlined_call_operand.vmem [shape: f32[1,128], index: 2, kind: input, shape index: {}]   ;;  %s1382_s3 = inlined_call_operand.hbm [shape: f32[128,128], index: 3, kind: input, shape index: {}]   ;;  %s1383_s4 = inlined_call_operand.hbm [shape: f32[4,128], index: 4, kind: output, shape index: {}]  }
   0x1   :  { %10 = vsyncpa [#allocation6], 0  ;;  %s28_s17 = sshll.u32 %s1380_s1, 4  ;;  %s29_s17 = int_to_ptr.hbm [resolvable:$true] %s28_s17 }
   0x2   :  { %11 = vsyncpa [#allocation4], 0  ;;  %s938_s18 = smov [#allocation5]   ;;  %s17_s22 = sshll.u32 %s1379_s0, 4  ;;  %s18_s22 = int_to_ptr.hbm [resolvable:$true] %s17_s22 }
   0x3   :  { %s30_s19 = sshll.u32 %s938_s18, 4  ;;  %s939_s23 = smov [#allocation2]   ;;  %s31_s19 = int_to_ptr.vmem [resolvable:$true] %s30_s19 }
   0x4   :  { %33 = dma.hbm_to_vmem [thread:$0]  %s29_s17, 64, %s31_s19, [#allocation6]  }
   0x5   :  { %s19_s24 = sshll.u32 %s939_s23, 4  ;;  %s40_s27 = sshll.u32 %s1382_s3, 4  ;;  %s20_s24 = int_to_ptr.vmem [resolvable:$true] %s19_s24  ;;  %s41_s27 = int_to_ptr.hbm [resolvable:$true] %s40_s27 }
   0x6   :  { %22 = dma.hbm_to_vmem [thread:$0]  %s18_s22, 64, %s20_s24, [#allocation3]  }
   0x7   :  { %s940_s1 = smov [#allocation7]   ;;  %s941_s29 = smov 128  }
   0x8   :  { %s42_s28 = sshll.u32 %s940_s1, 4  ;;  %s942_s30 = smov 8   ;;  %s43_s28 = int_to_ptr.vmem [resolvable:$true] %s42_s28 }
   0x9   :  { %48 = dma.hbm_to_vmem [thread:$0]  %s41_s27, 2048, %s43_s28, [#allocation6], %s941_s29, %s941_s29, %s942_s30  }
   0xa   :  { %932 = dma.done.wait [#allocation3], 64  }
   0xb   :  { %933 = vsyncadd [#allocation3], 4294967232 }
   0xc   :  { %934 = dma.done.wait [#allocation6], 2112  }
   0xd   :  { %935 = vsyncadd [#allocation6], 4294965184  ;;  %v78_v0 = vld [vmem:[#allocation7 + $0x78] sm:$0xff]  ;;  %v77_v1 = vld [vmem:[#allocation7 + $0x70] sm:$0xff]  ;;  %s943_s5 = smov [#allocation8]   ;;  %s811_s9 = sshll.u32 %s1383_s4, 4  ;;  %s812_s9 = int_to_ptr.hbm [resolvable:$true] %s811_s9 }
   0xe   :  { %v76_v2 = vld [vmem:[#allocation7 + $0x68] sm:$0xff]  ;;  %v978_v3 = vand.u32 4294901760, %v78_v0  ;;  %v980_v4 = vand.u32 4294901760, %v77_v1  ;;  %v75_v6 = vld [vmem:[#allocation7 + $0x60] sm:$0xff]  ;;  %v74_v7 = vld [vmem:[#allocation7 + $0x58] sm:$0xff]  ;;  %s809_s6 = sshll.u32 %s943_s5, 4  ;;  %s810_s6 = int_to_ptr.vmem [resolvable:$true] %s809_s6 }
   0xf   :  { %v982_v5 = vand.u32 4294901760, %v76_v2  ;;  %v73_v8 = vld [vmem:[#allocation7 + $0x50] sm:$0xff]  ;;  %v984_v9 = vand.u32 4294901760, %v75_v6  ;;  %v986_v10 = vand.u32 4294901760, %v74_v7  ;;  %v72_v12 = vld [vmem:[#allocation7 + $0x48] sm:$0xff]  ;;  %v71_v13 = vld [vmem:[#allocation7 + $0x40] sm:$0xff] }
  0x10   :  { %v988_v11 = vand.u32 4294901760, %v73_v8  ;;  %80 = vmatpush.msra.mxu0 %v978_v3  ;;  %v992_v14 = vsub.f32 %v78_v0, %v978_v3  ;;  %v995_v15 = vsub.f32 %v77_v1, %v980_v4  ;;  %v1000_v17 = vand.u32 4294901760, %v72_v12  ;;  %v70_v18 = vld [vmem:[#allocation7 + $0x38] sm:$0xff]  ;;  %276 = vmatpush.msra.mxu3 %v978_v3  ;;  %v69_v26 = vld [vmem:[#allocation7 + $0x30] sm:$0xff]  ;;  %v68_v36 = vld [vmem:[#allocation7 + $0x28] sm:$0xff] }
  0x11   :  { %v998_v16 = vsub.f32 %v76_v2, %v982_v5  ;;  %v1004_v19 = vsub.f32 %v75_v6, %v984_v9  ;;  %v1007_v20 = vsub.f32 %v74_v7, %v986_v10  ;;  %v1022_v25 = vand.u32 4294901760, %v71_v13  ;;  %v67_v42 = vld [vmem:[#allocation7 + $0x20] sm:$0xff]  ;;  %v66_v47 = vld [vmem:[#allocation7 + $0x18] sm:$0xff]  ;;  %v65_v55 = vld [vmem:[#allocation7 + $0x10] sm:$0xff] }
  0x12   :  { %v1010_v21 = vsub.f32 %v73_v8, %v988_v11  ;;  %82 = vmatpush.msra.mxu0 %v980_v4  ;;  %v1014_v22 = vand.u32 4294901760, %v992_v14  ;;  %v1017_v23 = vand.u32 4294901760, %v995_v15  ;;  %223 = vmatpush.msra.mxu2 %v992_v14  ;;  %v1028_v28 = vand.u32 4294901760, %v70_v18  ;;  %v64_v60 = vld [vmem:[#allocation7 + $0x8] sm:$0xff]  ;;  %v63_v1 = vld [vmem:[#allocation7] sm:$0xff] }
  0x13   :  { %v1020_v24 = vand.u32 4294901760, %v998_v16  ;;  %v1026_v27 = vand.u32 4294901760, %v1004_v19  ;;  %v1031_v29 = vsub.f32 %v72_v12, %v1000_v17  ;;  %278 = vmatpush.msra.mxu3 %v980_v4  ;;  %v1042_v33 = vand.u32 4294901760, %v1007_v20  ;;  %v1132_v7 = vld [vmem:[#allocation2] sm:$0xf] }
  0x14   :  { %84 = vmatpush.msra.mxu0 %v982_v5  ;;  %v123_v30 = vsub.f32 %v992_v14, %v1014_v22  ;;  %v129_v31 = vsub.f32 %v995_v15, %v1017_v23  ;;  %226 = vmatpush.msra.mxu2 %v995_v15  ;;  %v1046_v34 = vand.u32 4294901760, %v1010_v21  ;;  %v1048_v35 = vand.u32 4294901760, %v69_v26  ;;  %1398 = vst [vmem:[#allocation18_spill] sm:$0xff] %v1132_v7 }
  0x15   :  { %v135_v32 = vsub.f32 %v998_v16, %v1020_v24  ;;  %280 = vmatpush.msra.mxu3 %v982_v5  ;;  %v141_v39 = vsub.f32 %v1004_v19, %v1026_v27  ;;  %v1059_v40 = vsub.f32 %v71_v13, %v1022_v25  ;;  %v1063_v41 = vand.u32 4294901760, %v1031_v29 }
  0x16   :  { %v1051_v37 = vand.u32 4294901760, %v123_v30  ;;  %86 = vmatpush.msra.mxu0 %v984_v9  ;;  %v1054_v38 = vand.u32 4294901760, %v129_v31  ;;  %229 = vmatpush.msra.mxu2 %v998_v16  ;;  %v147_v44 = vsub.f32 %v1007_v20, %v1042_v33  ;;  %v1072_v45 = vand.u32 4294901760, %v68_v36 }
  0x17   :  { %1392 = vst [vmem:[#allocation12_spill] sm:$0xff] %v1059_v40  ;;  %282 = vmatpush.msra.mxu3 %v984_v9  ;;  %v1068_v43 = vand.u32 4294901760, %v135_v32  ;;  %v1075_v46 = vsub.f32 %v70_v18, %v1028_v28  ;;  %v153_v48 = vsub.f32 %v1010_v21, %v1046_v34  ;;  %v1083_v49 = vand.u32 4294901760, %v141_v39 }
  0x18   :  { %125 = vmatpush.msra.mxu1 %v1051_v37  ;;  %88 = vmatpush.msra.mxu0 %v986_v10  ;;  %v1086_v50 = vand.u32 4294901760, %v1059_v40  ;;  %v1088_v51 = vand.u32 4294901760, %v67_v42  ;;  %v1091_v52 = vsub.f32 %v69_v26, %v1048_v35  ;;  %v159_v53 = vsub.f32 %v1031_v29, %v1063_v41 }
  0x19   :  { %1393 = vst [vmem:[#allocation13_spill] sm:$0xff] %v1075_v46  ;;  %232 = vmatpush.msra.mxu2 %v1004_v19  ;;  %284 = vmatpush.msra.mxu3 %v986_v10  ;;  %v1095_v54 = vand.u32 4294901760, %v66_v47  ;;  %v1101_v56 = vand.u32 4294901760, %v147_v44  ;;  %v1104_v57 = vand.u32 4294901760, %v1075_v46  ;;  %v1107_v58 = vsub.f32 %v68_v36, %v1072_v45 }
  0x1a   :  { %131 = vmatpush.msra.mxu1 %v1054_v38  ;;  %90 = vmatpush.msra.mxu0 %v988_v11  ;;  %1394 = vst [vmem:[#allocation14_spill] sm:$0xff] %v1091_v52  ;;  %v1109_v59 = vand.u32 4294901760, %v153_v48  ;;  %v165_v61 = vsub.f32 %v1059_v40, %v1086_v50  ;;  %v1118_v62 = vand.u32 4294901760, %v1091_v52  ;;  %v1120_v63 = vand.u32 4294901760, %v65_v55 }
  0x1b   :  { %235 = vmatpush.msra.mxu2 %v1007_v20  ;;  %286 = vmatpush.msra.mxu3 %v988_v11  ;;  %1395 = vst [vmem:[#allocation15_spill] sm:$0xff] %v1107_v58  ;;  %v1123_v0 = vsub.f32 %v67_v42, %v1088_v51  ;;  %v1125_v2 = vand.u32 4294901760, %v159_v53  ;;  %v1128_v6 = vsub.f32 %v66_v47, %v1095_v54  ;;  %v1139_v12 = vand.u32 4294901760, %v1107_v58 }
  0x1c   :  { %137 = vmatpush.msra.mxu1 %v1068_v43  ;;  %92 = vmatpush.msra.mxu0 %v1000_v17  ;;  %v171_v8 = vsub.f32 %v1075_v46, %v1104_v57  ;;  %v1141_v13 = vand.u32 4294901760, %v64_v60  ;;  %v1144_v18 = vand.u32 4294901760, %v1132_v7  ;;  %v1146_v26 = vand.u32 4294901760, %v63_v1 }
  0x1d   :  { %238 = vmatpush.msra.mxu2 %v1010_v21  ;;  %288 = vmatpush.msra.mxu3 %v1000_v17  ;;  %1396 = vst [vmem:[#allocation16_spill] sm:$0xff] %v1123_v0  ;;  %v1152_v30 = vand.u32 4294901760, %v165_v61  ;;  %v177_v31 = vsub.f32 %v1091_v52, %v1118_v62  ;;  %v1157_v32 = vand.u32 4294901760, %v1123_v0  ;;  %v1160_v36 = vsub.f32 %v65_v55, %v1120_v63 }
  0x1e   :  { %143 = vmatpush.msra.mxu1 %v1083_v49  ;;  %94 = vmatpush.msra.mxu0 %v1022_v25  ;;  %1397 = vst [vmem:[#allocation17_spill] sm:$0xff] %v1128_v6  ;;  %v1163_v39 = vand.u32 4294901760, %v1128_v6  ;;  %v1169_v42 = vand.u32 4294901760, %v171_v8  ;;  %v183_v44 = vsub.f32 %v1107_v58, %v1139_v12  ;;  %v1174_v47 = vsub.f32 %v64_v60, %v1141_v13 }
  0x1f   :  { %241 = vmatpush.msra.mxu2 %v1031_v29  ;;  %290 = vmatpush.msra.mxu3 %v1022_v25  ;;  %1399 = vst [vmem:[#allocation19_spill] sm:$0xff] %v1160_v36  ;;  %v112_v48 = vsub.f32 %v1132_v7, %v1144_v18  ;;  %v1182_v53 = vand.u32 4294901760, %v177_v31  ;;  %v189_v55 = vsub.f32 %v1123_v0, %v1157_v32  ;;  %v1187_v61 = vand.u32 4294901760, %v1160_v36 }
  0x20   :  { %149 = vmatpush.msra.mxu1 %v1101_v56  ;;  %96 = vmatpush.msra.mxu0 %v1028_v28  ;;  %v1190_v60 = vsub.f32 %v63_v1, %v1146_v26  ;;  %v1196_v8 = vand.u32 4294901760, %v183_v44  ;;  %v195_v31 = vsub.f32 %v1128_v6, %v1163_v39  ;;  %v1201_v7 = vand.u32 4294901760, %v1174_v47 }
  0x21   :  { %244 = vmatpush.msra.mxu2 %v1059_v40  ;;  %292 = vmatpush.msra.mxu3 %v1028_v28  ;;  %v1207_v1 = vand.u32 4294901760, %v189_v55  ;;  %v201_v44 = vsub.f32 %v1160_v36, %v1187_v61 }
  0x22   :  { %155 = vmatpush.msra.mxu1 %v1109_v59  ;;  %98 = vmatpush.msra.mxu0 %v1048_v35  ;;  %v207_v55 = vsub.f32 %v1174_v47, %v1201_v7 }
  0x23   :  { %247 = vmatpush.msra.mxu2 %v1075_v46  ;;  %294 = vmatpush.msra.mxu3 %v1048_v35 }
  0x24   :  { %161 = vmatpush.msra.mxu1 %v1125_v2  ;;  %100 = vmatpush.msra.mxu0 %v1072_v45 }
  0x25   :  { %250 = vmatpush.msra.mxu2 %v1091_v52  ;;  %296 = vmatpush.msra.mxu3 %v1072_v45  ;;  %v113_v52 = vand.u32 4294901760, %v112_v48 }
  0x26   :  { %167 = vmatpush.msra.mxu1 %v1152_v30  ;;  %102 = vmatpush.msra.mxu0 %v1088_v51 }
  0x27   :  { %253 = vmatpush.msra.mxu2 %v1107_v58  ;;  %298 = vmatpush.msra.mxu3 %v1088_v51  ;;  %v1212_v58 = vand.u32 4294901760, %v1190_v60  ;;  %v114_v46 = vsub.f32 %v112_v48, %v113_v52 }
  0x28   :  { %173 = vmatpush.msra.mxu1 %v1169_v42  ;;  %104 = vmatpush.msra.mxu0 %v1095_v54 }
  0x29   :  { %256 = vmatpush.msra.mxu2 %v1123_v0  ;;  %300 = vmatpush.msra.mxu3 %v1095_v54  ;;  %v1218_v0 = vand.u32 4294901760, %v195_v31  ;;  %v213_v40 = vsub.f32 %v1190_v60, %v1212_v58  ;;  %v1233_v31 = vand.u32 4294901760, %v207_v55 }
  0x2a   :  { %179 = vmatpush.msra.mxu1 %v1182_v53  ;;  %106 = vmatpush.msra.mxu0 %v1120_v63 }
  0x2b   :  { %259 = vmatpush.msra.mxu2 %v1128_v6  ;;  %302 = vmatpush.msra.mxu3 %v1120_v63  ;;  %v1226_v6 = vand.u32 4294901760, %v201_v44  ;;  %v1239_v44 = vand.u32 4294901760, %v213_v40 }
  0x2c   :  { %185 = vmatpush.msra.mxu1 %v1196_v8  ;;  %108 = vmatpush.msra.mxu0 %v1141_v13 }
  0x2d   :  { %262 = vmatpush.msra.mxu2 %v1160_v36  ;;  %304 = vmatpush.msra.mxu3 %v1141_v13  ;;  %v115_v36 = vand.u32 4294901760, %v114_v46 }
  0x2e   :  { %191 = vmatpush.msra.mxu1 %v1207_v1  ;;  %110 = vmatpush.msra.mxu0 %v1146_v26 }
  0x2f   :  { %265 = vmatpush.msra.mxu2 %v1174_v47  ;;  %306 = vmatpush.msra.mxu3 %v1146_v26 }
  0x30   :  { %317 = vmatpush.msrb.mxu0 %v1014_v22  ;;  %197 = vmatpush.msra.mxu1 %v1218_v0 }
  0x31   :  { %268 = vmatpush.msra.mxu2 %v1190_v60  ;;  %310 = vmatmul.f32.vlgmr.msra.gmra.mxu3 %v113_v52 }
  0x32   :  { %321 = vmatpush.msrb.mxu0 %v1017_v23  ;;  %203 = vmatpush.msra.mxu1 %v1226_v6 }
  0x33   :  { %271 = vmatmul.f32.vlgmr.msra.gmra.mxu2 %v112_v48  ;;  %116 = vmatmul.f32.vlgmr.msra.gmra.mxu0 %v115_v36 }
  0x34   :  { %325 = vmatpush.msrb.mxu0 %v1020_v24  ;;  %209 = vmatpush.msra.mxu1 %v1233_v31 }
  0x35   :  { %469 = vmatpush.msrb.mxu3 %v1051_v37  ;;  %424 = vmatpush.msrb.mxu2 %v978_v3 }
  0x36   :  { %329 = vmatpush.msrb.mxu0 %v1026_v27  ;;  %215 = vmatpush.msra.mxu1 %v1239_v44 }
  0x37   :  { %217 = vmatmul.f32.vlgmr.msra.gmra.mxu1 %v1144_v18  ;;  %475 = vmatpush.msrb.mxu3 %v1054_v38 }
  0x38   :  { %384 = vmatpush.msrb.mxu1 %v978_v3  ;;  %333 = vmatpush.msrb.mxu0 %v1042_v33 }
  0x39   :  { %481 = vmatpush.msrb.mxu3 %v1068_v43  ;;  %426 = vmatpush.msrb.mxu2 %v980_v4  ;;  %v62_v43 = vld [vmem:[#allocation5] sm:$0xf] }
  0x3a   :  { %386 = vmatpush.msrb.mxu1 %v980_v4  ;;  %337 = vmatpush.msrb.mxu0 %v1046_v34 }
  0x3b   :  { %487 = vmatpush.msrb.mxu3 %v1083_v49  ;;  %428 = vmatpush.msrb.mxu2 %v982_v5 }
  0x3c   :  { %388 = vmatpush.msrb.mxu1 %v982_v5  ;;  %341 = vmatpush.msrb.mxu0 %v1063_v41 }
  0x3d   :  { %493 = vmatpush.msrb.mxu3 %v1101_v56  ;;  %430 = vmatpush.msrb.mxu2 %v984_v9 }
  0x3e   :  { %390 = vmatpush.msrb.mxu1 %v984_v9  ;;  %345 = vmatpush.msrb.mxu0 %v1086_v50 }
  0x3f   :  { %499 = vmatpush.msrb.mxu3 %v1109_v59  ;;  %432 = vmatpush.msrb.mxu2 %v986_v10 }
  0x40   :  { %392 = vmatpush.msrb.mxu1 %v986_v10  ;;  %349 = vmatpush.msrb.mxu0 %v1104_v57 }
  0x41   :  { %505 = vmatpush.msrb.mxu3 %v1125_v2  ;;  %434 = vmatpush.msrb.mxu2 %v988_v11 }
  0x42   :  { %394 = vmatpush.msrb.mxu1 %v988_v11  ;;  %353 = vmatpush.msrb.mxu0 %v1118_v62 }
  0x43   :  { %511 = vmatpush.msrb.mxu3 %v1152_v30  ;;  %436 = vmatpush.msrb.mxu2 %v1000_v17 }
  0x44   :  { %396 = vmatpush.msrb.mxu1 %v1000_v17  ;;  %357 = vmatpush.msrb.mxu0 %v1139_v12 }
  0x45   :  { %517 = vmatpush.msrb.mxu3 %v1169_v42  ;;  %438 = vmatpush.msrb.mxu2 %v1022_v25 }
  0x46   :  { %398 = vmatpush.msrb.mxu1 %v1022_v25  ;;  %361 = vmatpush.msrb.mxu0 %v1157_v32 }
  0x47   :  { %523 = vmatpush.msrb.mxu3 %v1182_v53  ;;  %440 = vmatpush.msrb.mxu2 %v1028_v28 }
  0x48   :  { %400 = vmatpush.msrb.mxu1 %v1028_v28  ;;  %365 = vmatpush.msrb.mxu0 %v1163_v39 }
  0x49   :  { %529 = vmatpush.msrb.mxu3 %v1196_v8  ;;  %442 = vmatpush.msrb.mxu2 %v1048_v35 }
  0x4a   :  { %402 = vmatpush.msrb.mxu1 %v1048_v35  ;;  %369 = vmatpush.msrb.mxu0 %v1187_v61 }
  0x4b   :  { %535 = vmatpush.msrb.mxu3 %v1207_v1  ;;  %444 = vmatpush.msrb.mxu2 %v1072_v45  ;;  %v829_v1 = vld [vmem:[%s1381_s2] ss:$0 sm:$0xff] }
  0x4c   :  { %404 = vmatpush.msrb.mxu1 %v1072_v45  ;;  %373 = vmatpush.msrb.mxu0 %v1201_v7 }
  0x4d   :  { %541 = vmatpush.msrb.mxu3 %v1218_v0  ;;  %446 = vmatpush.msrb.mxu2 %v1088_v51 }
  0x4e   :  { %406 = vmatpush.msrb.mxu1 %v1088_v51  ;;  %377 = vmatpush.msrb.mxu0 %v1212_v58 }
  0x4f   :  { %379 = vmatmul.f32.vlgmr.msrb.gmra.mxu0 %v1144_v18  ;;  %547 = vmatpush.msrb.mxu3 %v1226_v6 }
  0x50   :  { %408 = vmatpush.msrb.mxu1 %v1095_v54  ;;  %567 = vmatpush.msra.mxu0 %v992_v14  ;;  %v1406_v14 = vld [vmem:[#allocation19_spill] sm:$0xff] }
  0x51   :  { %553 = vmatpush.msrb.mxu3 %v1233_v31  ;;  %448 = vmatpush.msrb.mxu2 %v1095_v54 }
  0x52   :  { %410 = vmatpush.msrb.mxu1 %v1120_v63  ;;  %570 = vmatpush.msra.mxu0 %v995_v15 }
  0x53   :  { %559 = vmatpush.msrb.mxu3 %v1239_v44  ;;  %450 = vmatpush.msrb.mxu2 %v1120_v63 }
  0x54   :  { %412 = vmatpush.msrb.mxu1 %v1141_v13  ;;  %573 = vmatpush.msra.mxu0 %v998_v16 }
  0x55   :  { %728 = vmatpush.msra.mxu3 %v978_v3  ;;  %452 = vmatpush.msrb.mxu2 %v1141_v13 }
  0x56   :  { %414 = vmatpush.msrb.mxu1 %v1146_v26  ;;  %576 = vmatpush.msra.mxu0 %v1004_v19 }
  0x57   :  { %416 = vmatmul.f32.vlgmr.msrb.gmra.mxu1 %v1144_v18  ;;  %730 = vmatpush.msra.mxu3 %v980_v4 }
  0x58   :  { %620 = vmatpush.msra.mxu1 %v978_v3  ;;  %579 = vmatpush.msra.mxu0 %v1007_v20  ;;  %v1400_v3 = vld [vmem:[#allocation12_spill] sm:$0xff] }
  0x59   :  { %732 = vmatpush.msra.mxu3 %v982_v5  ;;  %454 = vmatpush.msrb.mxu2 %v1146_v26 }
  0x5a   :  { %622 = vmatpush.msra.mxu1 %v980_v4  ;;  %582 = vmatpush.msra.mxu0 %v1010_v21  ;;  %v1401_v4 = vld [vmem:[#allocation13_spill] sm:$0xff] }
  0x5b   :  { %734 = vmatpush.msra.mxu3 %v984_v9  ;;  %661 = vmatpush.msra.mxu2 %v1014_v22 }
  0x5c   :  { %624 = vmatpush.msra.mxu1 %v982_v5  ;;  %585 = vmatpush.msra.mxu0 %v1031_v29  ;;  %v1402_v5 = vld [vmem:[#allocation14_spill] sm:$0xff] }
  0x5d   :  { %736 = vmatpush.msra.mxu3 %v986_v10  ;;  %665 = vmatpush.msra.mxu2 %v1017_v23  ;;  %v1407_v29 = vld [vmem:[#allocation18_spill] sm:$0xff] }
  0x5e   :  { %626 = vmatpush.msra.mxu1 %v984_v9  ;;  %588 = vmatpush.msra.mxu0 %v1400_v3  ;;  %v1403_v9 = vld [vmem:[#allocation15_spill] sm:$0xff] }
  0x5f   :  { %738 = vmatpush.msra.mxu3 %v988_v11  ;;  %669 = vmatpush.msra.mxu2 %v1020_v24 }
  0x60   :  { %628 = vmatpush.msra.mxu1 %v986_v10  ;;  %591 = vmatpush.msra.mxu0 %v1401_v4  ;;  %v1404_v10 = vld [vmem:[#allocation16_spill] sm:$0xff] }
  0x61   :  { %740 = vmatpush.msra.mxu3 %v1000_v17  ;;  %673 = vmatpush.msra.mxu2 %v1026_v27 }
  0x62   :  { %630 = vmatpush.msra.mxu1 %v988_v11  ;;  %594 = vmatpush.msra.mxu0 %v1402_v5  ;;  %v1405_v11 = vld [vmem:[#allocation17_spill] sm:$0xff] }
  0x63   :  { %742 = vmatpush.msra.mxu3 %v1022_v25  ;;  %677 = vmatpush.msra.mxu2 %v1042_v33 }
  0x64   :  { %632 = vmatpush.msra.mxu1 %v1000_v17  ;;  %597 = vmatpush.msra.mxu0 %v1403_v9 }
  0x65   :  { %744 = vmatpush.msra.mxu3 %v1028_v28  ;;  %681 = vmatpush.msra.mxu2 %v1046_v34 }
  0x66   :  { %634 = vmatpush.msra.mxu1 %v1022_v25  ;;  %600 = vmatpush.msra.mxu0 %v1404_v10 }
  0x67   :  { %746 = vmatpush.msra.mxu3 %v1048_v35  ;;  %685 = vmatpush.msra.mxu2 %v1063_v41 }
  0x68   :  { %636 = vmatpush.msra.mxu1 %v1028_v28  ;;  %603 = vmatpush.msra.mxu0 %v1405_v11 }
  0x69   :  { %748 = vmatpush.msra.mxu3 %v1072_v45  ;;  %689 = vmatpush.msra.mxu2 %v1086_v50 }
  0x6a   :  { %638 = vmatpush.msra.mxu1 %v1048_v35  ;;  %606 = vmatpush.msra.mxu0 %v1406_v14 }
  0x6b   :  { %750 = vmatpush.msra.mxu3 %v1088_v51  ;;  %693 = vmatpush.msra.mxu2 %v1104_v57 }
  0x6c   :  { %640 = vmatpush.msra.mxu1 %v1072_v45  ;;  %609 = vmatpush.msra.mxu0 %v1174_v47  ;;  %v822_v45 = vmul.f32 -1.442695, %v62_v43 }
  0x6d   :  { %752 = vmatpush.msra.mxu3 %v1095_v54  ;;  %697 = vmatpush.msra.mxu2 %v1118_v62 }
  0x6e   :  { %642 = vmatpush.msra.mxu1 %v1088_v51  ;;  %612 = vmatpush.msra.mxu0 %v1190_v60  ;;  %830 = vpow2.f32 %v822_v45 }
  0x6f   :  { %754 = vmatpush.msra.mxu3 %v1120_v63  ;;  %701 = vmatpush.msra.mxu2 %v1139_v12 }
  0x70   :  { %644 = vmatpush.msra.mxu1 %v1095_v54 }
  0x71   :  { %756 = vmatpush.msra.mxu3 %v1141_v13  ;;  %705 = vmatpush.msra.mxu2 %v1157_v32 }
  0x72   :  { %646 = vmatpush.msra.mxu1 %v1120_v63 }
  0x73   :  { %758 = vmatpush.msra.mxu3 %v1146_v26  ;;  %709 = vmatpush.msra.mxu2 %v1163_v39 }
  0x74   :  { %648 = vmatpush.msra.mxu1 %v1141_v13  ;;  %v831_v46 = vpop.eup %830 }
  0x75   :  { %713 = vmatpush.msra.mxu2 %v1187_v61  ;;  %v785_v51 = vadd.f32 1.0, %v831_v46 }
  0x76   :  { %650 = vmatpush.msra.mxu1 %v1146_v26 }
  0x77   :  { %717 = vmatpush.msra.mxu2 %v1201_v7  ;;  %832 = vrcp.f32 %v785_v51  ;;  %vm791_vm0 = vweird.f32 %v785_v51  ;;  %v797_v32 = vand.u32 2147483648, %v785_v51  ;;  %v795_v39 = vand.u32 2147483647, %v785_v51 }
  0x79   :  { %721 = vmatpush.msra.mxu2 %v1212_v58  ;;  %v798_v48 = vor.u32 1.1754944e-38, %v797_v32  ;;  %vm796_vm3 = vcmp.eq.f32.partialorder %v795_v39, 8.507059e+37 }
  0x7d   :  { %v833_v63 = vpop.eup %832 }
  0x7e   :  { %v787_v7 = vmul.f32 %v833_v63, %v785_v51  ;;  %vm792_vm1 = vweird.f32 %v833_v63 }
  0x7f   :  { %vm793_vm2 = vmor %vm791_vm0, %vm792_vm1 }
  0x80   :  { %v788_v13 = vsub.f32 1.0, %v787_v7 }
  0x82   :  { %v789_v18 = vmul.f32 %v833_v63, %v788_v13 }
  0x84   :  { %v790_v36 = vadd.f32 %v833_v63, %v789_v18 }
  0x86   :  { %v794_v53 = vsel %vm793_vm2, %v833_v63, %v790_v36 }
  0x87   :  { %v799_v8 = vsel %vm796_vm3, %v798_v48, %v794_v53 }
  0x88   :  { %v801_v44 = vmul.f32 %v799_v8, %v62_v43 }
  0xb0   :  { %v117_v16 = vpop.f32.mrf.mxu0 }
  0xb4   :  { %v218_v15 = vpop.f32.mrf.mxu1  ;;  %v311_v21 = vpop.f32.mrf.mxu3 }
  0xb5   :  { %v219_v17 = vadd.f32 %v218_v15, %v117_v16 }
  0xb6   :  { %v272_v19 = vpop.f32.mrf.mxu2 }
  0xb7   :  { %v273_v20 = vadd.f32 %v272_v19, %v219_v17 }
  0xb9   :  { %v312_v22 = vadd.f32 %v311_v21, %v273_v20 }
  0xcc   :  { %v380_v23 = vpop.f32.mrf.mxu0 }
  0xcd   :  { %v381_v24 = vadd.f32 %v380_v23, %v312_v22 }
  0xd4   :  { %v417_v25 = vpop.f32.mrf.mxu1 }
  0xd5   :  { %v418_v27 = vadd.f32 %v417_v25, %v381_v24 }
  0xd7   :  { %v420_v28 = vmul.f32 0.03125, %v418_v27 }
  0xd9   :  { %v421_v33 = vsub.f32 %v1407_v29, %v420_v28 }
  0xdb   :  { %v422_v34 = vmul.f32 %v421_v33, %v421_v33 }
  0xdd   :  { %v455_v35 = vand.u32 4294901760, %v422_v34 }
  0xdf   :  { %v456_v37 = vsub.f32 %v422_v34, %v455_v35  ;;  %561 = vmatmul.f32.vlgmr.msrb.gmra.mxu3 %v455_v35 }
  0xe1   :  { %615 = vmatmul.f32.vlgmr.msra.gmra.mxu0 %v456_v37  ;;  %v457_v38 = vand.u32 4294901760, %v456_v37 }
  0xe3   :  { %654 = vmatmul.f32.vlgmr.msra.gmra.mxu1 %v457_v38  ;;  %v458_v40 = vsub.f32 %v456_v37, %v457_v38 }
  0xe5   :  { %v459_v41 = vand.u32 4294901760, %v458_v40 }
  0xe7   :  { %460 = vmatmul.f32.vlgmr.msrb.gmra.mxu2 %v459_v41  ;;  %760 = vmatmul.f32.vlgmr.msra.gmra.mxu3 %v455_v35 }
  0xef   :  { %723 = vmatmul.f32.vlgmr.msra.gmra.mxu2 %v455_v35 }
 0x15e   :  { %v616_v54 = vpop.f32.mrf.mxu0 }
 0x160   :  { %v655_v57 = vpop.f32.mrf.mxu1 }
 0x162   :  { %v562_v49 = vpop.f32.mrf.mxu3 }
 0x16a   :  { %v461_v50 = vpop.f32.mrf.mxu2  ;;  %v761_v0 = vpop.f32.mrf.mxu3 }
 0x16b   :  { %v563_v52 = vadd.f32 %v562_v49, %v461_v50 }
 0x16d   :  { %v617_v56 = vadd.f32 %v616_v54, %v563_v52 }
 0x16f   :  { %v656_v58 = vadd.f32 %v655_v57, %v617_v56 }
 0x172   :  { %v724_v59 = vpop.f32.mrf.mxu2 }
 0x173   :  { %v725_v62 = vadd.f32 %v724_v59, %v656_v58 }
 0x175   :  { %v762_v2 = vadd.f32 %v761_v0, %v725_v62 }
 0x177   :  { %v764_v6 = vmul.f32 0.03125, %v762_v2 }
 0x179   :  { %v765_v12 = vadd.f32 1e-05, %v764_v6 }
 0x17b   :  { %834 = vrsqrt.f32 %v765_v12  ;;  %vm772_vm5 = vweird.f32 %v765_v12 }
 0x181   :  { %v835_v26 = vpop.eup %834 }
 0x182   :  { %v767_v30 = vmul.f32 %v835_v26, %v765_v12  ;;  %vm773_vm4 = vweird.f32 %v835_v26 }
 0x183   :  { %vm774_vm6 = vmor %vm772_vm5, %vm773_vm4 }
 0x184   :  { %v768_v42 = vmul.f32 %v835_v26, %v767_v30 }
 0x186   :  { %v769_v47 = vmul.f32 0.5, %v768_v42 }
 0x188   :  { %v770_v61 = vsub.f32 1.5, %v769_v47 }
 0x18a   :  { %v771_v60 = vmul.f32 %v835_v26, %v770_v61 }
 0x18c   :  { %v775_v55 = vsel %vm774_vm6, %v835_v26, %v771_v60 }
 0x18d   :  { %v776_v31 = vmul.f32 %v775_v55, %v421_v33 }
 0x18f   :  { %v781_v3 = vmul.f32 %v829_v1, %v776_v31 }
 0x191   :  { %v802_v4 = vmul.f32 %v801_v44, %v781_v3 }
 0x193   :  { %803 = vst [vmem:[#allocation8] sm:$0xf] %v802_v4 }
 0x194   :  { %814 = dma.vmem_to_hbm [thread:$0]  %s810_s6, 64, %s812_s9, [#allocation4]  }
 0x195   :  { %936 = dma.done.wait [#allocation4], 64  }
 0x196   :  { %937 = vsyncadd [#allocation4], 4294967232 }
 0x197   :  { %819 = vsyncpa [#allocation3], 1 }
 0x198   :  { %820 = vsyncpa [#allocation6], 1 }
 0x199   :  { %821 = vsyncpa [#allocation4], 1 }

</bundles_post_ra>
